<compile_context>
chip_gen: v5e
topology: v5e:2x2
jax: 0.10.0
libtpu: 0.0.40
codegen_flags: <defaults>
</compile_context>

<pallas_src>
import functools

import jax
import jax.numpy as jnp
from jax.experimental import pallas as pl
from jax.experimental.pallas import tpu as pltpu


def _round_up(x, m):
    return ((x + m - 1) // m) * m


def _vmem_capacity_bytes():
    try:
        info = pltpu.get_tpu_info()
        return int(getattr(info, "vmem_capacity_bytes", 64 << 20))
    except Exception:
        return 64 << 20   # conservative (v7x-sized) fallback


def ffn_kernel(x_ref, w1_ref, b1_ref, w2_ref, gbb_ref, o_ref, acc_ref, *, eps: float):
    # Grid: (token tiles [parallel], ff_dim chunks [arbitrary / reduction]).
    k = pl.program_id(1)
    nk = pl.num_programs(1)

    @pl.when(k == 0)
    def _():
        acc_ref[...] = jnp.zeros_like(acc_ref)

    # x tile is read as f32 and cast in-kernel (saves a separate wrapper cast pass).
    x = x_ref[...].astype(jnp.bfloat16)

    # Linear(dim, ff_dim) column chunk: bf16 operands on the MXU, f32 accumulation.
    h = jnp.dot(x, w1_ref[...], preferred_element_type=jnp.float32)
    # bias + ReLU fused; single bf16 materialization of the hidden chunk.
    h = jnp.maximum(h + b1_ref[...], 0.0).astype(jnp.bfloat16)

    # TODO(synk): Dropout is identity in eval mode; training-mode dropout would use
    # pltpu.prng_seed / pltpu.prng_random_bits + masking on h here.

    # Linear(ff_dim, dim) row chunk: accumulate into the f32 scratch.
    acc_ref[...] += jnp.dot(h, w2_ref[...], preferred_element_type=jnp.float32)

    @pl.when(k == nk - 1)
    def _():
        gbb = gbb_ref[...]                      # (3, dim): [b2; gamma; beta]
        y = acc_ref[...] + gbb[0:1, :]
        # Two-pass LayerNorm (mean, then centered variance) — numerically safe.
        mean = jnp.mean(y, axis=-1, keepdims=True)
        yc = y - mean
        var = jnp.mean(yc * yc, axis=-1, keepdims=True)
        y_norm = yc * jax.lax.rsqrt(var + eps)
        o_ref[...] = (y_norm * gbb[1:2, :] + gbb[2:3, :]).astype(o_ref.dtype)


def prepare_params(w1, b1, w2, b2, gamma, beta):
    """One-time parameter preparation (do NOT call per forward pass)."""
    dim, ff_dim = w1.shape
    return dict(
        w1=w1.astype(jnp.bfloat16),                              # (dim, ff_dim)
        b1=b1.reshape(1, ff_dim).astype(jnp.float32),            # (1, ff_dim)
        w2=w2.astype(jnp.bfloat16),                              # (ff_dim, dim)
        gbb=jnp.stack([b2, gamma, beta]).astype(jnp.float32),    # (3, dim)
    )


def feed_forward(x, params, *, eps=1e-5, tm=None, tk_ff=512, out_dtype=None):
    """x: (B, S, dim) -> (B, S, dim).  params from prepare_params()."""
    B, S, dim = x.shape
    w1, b1, w2, gbb = params["w1"], params["b1"], params["w2"], params["gbb"]
    ff_dim = w1.shape[1]
    n_tokens = B * S
    out_dtype = x.dtype if out_dtype is None else out_dtype

    vmem_cap = _vmem_capacity_bytes()

    # Row tile: large on 128 MiB parts (v5e/v6e), tighter on 64 MiB (v7x).
    if tm is None:
        tm = 512 if vmem_cap >= (96 << 20) else 256
    tm_eff = max(16, min(_round_up(tm, 16), _round_up(n_tokens, 16)))
    grid_m = pl.cdiv(n_tokens, tm_eff)        # Pallas masks the ragged last tile.

    # ff_dim chunk: multiple of 256 keeps v6e/v7x MXU passes packed.  Must divide
    # ff_dim exactly so the contraction never sees out-of-bounds garbage.
    tk = min(tk_ff, ff_dim)
    if ff_dim % tk != 0:
        tk = ff_dim  # TODO(synk): support ragged ff_dim chunking via masked K blocks.
    grid_k = ff_dim // tk

    x2 = x.reshape(n_tokens, dim)             # pure metadata reshape, no HBM pass

    # VMEM budget (bytes): streaming blocks double-buffered + accumulator + temps.
    vmem_need = (
        2 * tm_eff * dim * x2.dtype.itemsize                     # x tile (f32, 2 bufs)
        + 2 * dim * tk * 2                                       # W1 chunk bf16
        + 2 * tk * dim * 2                                       # W2 chunk bf16
        + 2 * tk * 4                                             # b1 chunk f32
        + 3 * dim * 4                                            # b2/gamma/beta (1 buf)
        + 2 * tm_eff * dim * jnp.dtype(out_dtype).itemsize       # out tile (2 bufs)
        + tm_eff * dim * 4                                       # f32 accumulator scratch
        + tm_eff * tk * (4 + 2)                                  # f32 h temp + bf16 h
    )
    # Leave headroom for Mosaic internal scratch: cap at 3/4 of physical VMEM
    # (48 MiB on v7x, 96 MiB on v5e/v6e).
    vmem_limit = int(min(max(vmem_need + (8 << 20), 32 << 20), vmem_cap * 3 // 4))

    out2 = pl.pallas_call(
        functools.partial(ffn_kernel, eps=eps),
        out_shape=jax.ShapeDtypeStruct((n_tokens, dim), out_dtype),
        grid_spec=pltpu.PrefetchScalarGridSpec(
            num_scalar_prefetch=0,
            grid=(grid_m, grid_k),
            in_specs=[
                # x tile: same block over the k axis -> fetched once per token tile.
                pl.BlockSpec((tm_eff, dim), lambda i, k: (i, 0)),
                pl.BlockSpec((dim, tk), lambda i, k: (0, k)),        # W1 column chunk
                pl.BlockSpec((1, tk), lambda i, k: (0, k)),          # b1 chunk
                pl.BlockSpec((tk, dim), lambda i, k: (k, 0)),        # W2 row chunk
                pl.BlockSpec((3, dim), lambda i, k: (0, 0),
                             pipeline_mode=pl.Buffered(1)),          # b2/gamma/beta
            ],
            out_specs=pl.BlockSpec((tm_eff, dim), lambda i, k: (i, 0)),
            scratch_shapes=[pltpu.VMEM((tm_eff, dim), jnp.float32)],
        ),
        # Token axis "parallel" -> sharded across the 2 TCs on v7x when grid_m >= 2;
        # ff_dim chunk axis is the reduction -> "arbitrary", last in the grid.
        compiler_params=pltpu.CompilerParams(
            dimension_semantics=("parallel", "arbitrary"),
            vmem_limit_bytes=vmem_limit),
    )(x2, w1, b1, w2, gbb)

    return out2.reshape(B, S, dim)


def reference(x, w1, b1, w2, b2, gamma, beta, eps=1e-5):
    h = jnp.maximum(x @ w1 + b1, 0.0)
    y = h @ w2 + b2
    mean = jnp.mean(y, axis=-1, keepdims=True)
    var = jnp.mean((y - mean) ** 2, axis=-1, keepdims=True)
    return (y - mean) * jax.lax.rsqrt(var + eps) * gamma + beta


if __name__ == "__main__":
    # Small shapes consistent with the module: batch=2, seq=8, dim=128, ff_dim=256.
    B, S, dim, ff_dim = 2, 8, 128, 256

    key = jax.random.PRNGKey(0)
    kx, k1, kb1, k2, kb2 = jax.random.split(key, 5)

    x = jax.random.normal(kx, (B, S, dim), dtype=jnp.float32)

    # Deterministic parameter init (synthetic; mimics nn.Linear's uniform init).
    bound1 = 1.0 / (dim ** 0.5)
    bound2 = 1.0 / (ff_dim ** 0.5)
    w1 = jax.random.uniform(k1, (dim, ff_dim), minval=-bound1, maxval=bound1,
                            dtype=jnp.float32)
    b1 = jax.random.uniform(kb1, (ff_dim,), minval=-bound1, maxval=bound1,
                            dtype=jnp.float32)
    w2 = jax.random.uniform(k2, (ff_dim, dim), minval=-bound2, maxval=bound2,
                            dtype=jnp.float32)
    b2 = jax.random.uniform(kb2, (dim,), minval=-bound2, maxval=bound2,
                            dtype=jnp.float32)
    gamma = jnp.ones((dim,), dtype=jnp.float32)   # LayerNorm weight init
    beta = jnp.zeros((dim,), dtype=jnp.float32)   # LayerNorm bias init

    # One-time parameter preparation (bf16 weights, packed LayerNorm params).
    params = prepare_params(w1, b1, w2, b2, gamma, beta)

    out = feed_forward(x, params)
    out = jax.block_until_ready(out)

    ref = reference(x, w1, b1, w2, b2, gamma, beta)
    assert out.shape == (B, S, dim)
    # bf16 matmul operands with f32 accumulation -> relaxed tolerance vs f32 ref.
    assert jnp.allclose(out, ref, atol=3e-2, rtol=3e-2), "mismatch vs reference"

    print("KERNEL_OK")
</pallas_src>

<mosaic_0001>
module attributes {stable_mosaic.version = 11 : i64} {
  func.func @ffn_kernel(%arg0: i32, %arg1: i32, %arg2: memref<16x128xf32, #tpu.memory_space<vmem>>, %arg3: memref<128x256xbf16, #tpu.memory_space<vmem>>, %arg4: memref<1x256xf32, #tpu.memory_space<vmem>>, %arg5: memref<256x128xbf16, #tpu.memory_space<vmem>>, %arg6: memref<3x128xf32, #tpu.memory_space<vmem>>, %arg7: memref<16x128xf32, #tpu.memory_space<vmem>>, %arg8: memref<16x128xf32, #tpu.memory_space<vmem>>) attributes {dimension_semantics = [#tpu.dimension_semantics<parallel>, #tpu.dimension_semantics<arbitrary>], iteration_bounds = array<i64: 1, 1>, scalar_prefetch = 0 : i64, scratch_operands = 1 : i64, tpu.core_type = #tpu.core_type<tc>, window_params = [{transform_indices = @transform_0, window_bounds = array<i64: 16, 128>}, {transform_indices = @transform_1, window_bounds = array<i64: 128, 256>}, {transform_indices = @transform_2, window_bounds = array<i64: 1, 256>}, {transform_indices = @transform_3, window_bounds = array<i64: 256, 128>}, {pipeline_mode = #tpu.pipeline_mode<synchronous>, transform_indices = @transform_4, window_bounds = array<i64: 3, 128>}, {transform_indices = @transform_5, window_bounds = array<i64: 16, 128>}]} {
    %c0_i32 = arith.constant 0 : i32
    %0 = arith.cmpi eq, %arg1, %c0_i32 : i32
    %1 = arith.extui %0 : i1 to i32
    %c0_i32_0 = arith.constant 0 : i32
    %2 = arith.cmpi ne, %1, %c0_i32_0 : i32
    scf.if %2 {
      %cst_16 = arith.constant 0.000000e+00 : f32
      %21 = vector.broadcast %cst_16 : f32 to vector<16x128xf32>
      %c0_17 = arith.constant 0 : index
      %c0_18 = arith.constant 0 : index
      %22 = vector.load %arg8[%c0_17, %c0_18] : memref<16x128xf32, #tpu.memory_space<vmem>>, vector<16x128xf32>
      tpu.vector_store %arg8[%c0_17, %c0_18], %21 {strides = array<i32>} : memref<16x128xf32, #tpu.memory_space<vmem>>, vector<16x128xf32>,
    } else {
    }
    %c0 = arith.constant 0 : index
    %c0_1 = arith.constant 0 : index
    %3 = vector.load %arg2[%c0, %c0_1] : memref<16x128xf32, #tpu.memory_space<vmem>>, vector<16x128xf32>
    %4 = arith.truncf %3 : vector<16x128xf32> to vector<16x128xbf16>
    %c0_2 = arith.constant 0 : index
    %c0_3 = arith.constant 0 : index
    %5 = vector.load %arg3[%c0_2, %c0_3] : memref<128x256xbf16, #tpu.memory_space<vmem>>, vector<128x256xbf16>
    %cst = arith.constant dense<0.000000e+00> : vector<16x256xf32>
    %6 = tpu.matmul %4, %5, %cst {dimension_numbers = #tpu.dot_dimension_numbers<[1], [0], [0], [1], [0, 0, 1, 1], [], []>} : vector<16x128xbf16>, vector<128x256xbf16>, vector<16x256xf32> -> vector<16x256xf32>
    %c0_4 = arith.constant 0 : index
    %c0_5 = arith.constant 0 : index
    %7 = vector.load %arg4[%c0_4, %c0_5] : memref<1x256xf32, #tpu.memory_space<vmem>>, vector<1x256xf32>
    %8 = vector.broadcast %7 : vector<1x256xf32> to vector<16x256xf32>
    %9 = arith.addf %6, %8 : vector<16x256xf32>
    %cst_6 = arith.constant 0.000000e+00 : f32
    %10 = vector.broadcast %cst_6 : f32 to vector<16x256xf32>
    %11 = arith.maximumf %9, %10 : vector<16x256xf32>
    %12 = arith.truncf %11 : vector<16x256xf32> to vector<16x256xbf16>
    %c0_7 = arith.constant 0 : index
    %c0_8 = arith.constant 0 : index
    %13 = vector.load %arg8[%c0_7, %c0_8] : memref<16x128xf32, #tpu.memory_space<vmem>>, vector<16x128xf32>
    %c0_9 = arith.constant 0 : index
    %c0_10 = arith.constant 0 : index
    %14 = vector.load %arg5[%c0_9, %c0_10] : memref<256x128xbf16, #tpu.memory_space<vmem>>, vector<256x128xbf16>
    %cst_11 = arith.constant dense<0.000000e+00> : vector<16x128xf32>
    %15 = tpu.matmul %12, %14, %cst_11 {dimension_numbers = #tpu.dot_dimension_numbers<[1], [0], [0], [1], [0, 0, 1, 1], [], []>} : vector<16x256xbf16>, vector<256x128xbf16>, vector<16x128xf32> -> vector<16x128xf32>
    %16 = arith.addf %13, %15 : vector<16x128xf32>
    %c0_12 = arith.constant 0 : index
    %c0_13 = arith.constant 0 : index
    %17 = vector.load %arg8[%c0_12, %c0_13] : memref<16x128xf32, #tpu.memory_space<vmem>>, vector<16x128xf32>
    tpu.vector_store %arg8[%c0_12, %c0_13], %16 {strides = array<i32>} : memref<16x128xf32, #tpu.memory_space<vmem>>, vector<16x128xf32>,
    %c0_i32_14 = arith.constant 0 : i32
    %18 = arith.cmpi eq, %arg1, %c0_i32_14 : i32
    %19 = arith.extui %18 : i1 to i32
    %c0_i32_15 = arith.constant 0 : i32
    %20 = arith.cmpi ne, %19, %c0_i32_15 : i32
    scf.if %20 {
      %c0_16 = arith.constant 0 : index
      %c0_17 = arith.constant 0 : index
      %21 = vector.load %arg6[%c0_16, %c0_17] : memref<3x128xf32, #tpu.memory_space<vmem>>, vector<3x128xf32>
      %c0_18 = arith.constant 0 : index
      %c0_19 = arith.constant 0 : index
      %22 = vector.load %arg8[%c0_18, %c0_19] : memref<16x128xf32, #tpu.memory_space<vmem>>, vector<16x128xf32>
      %23 = vector.extract_strided_slice %21 {offsets = [0, 0], sizes = [1, 128], strides = [1, 1]} : vector<3x128xf32> to vector<1x128xf32>
      %24 = vector.broadcast %23 : vector<1x128xf32> to vector<16x128xf32>
      %25 = arith.addf %22, %24 : vector<16x128xf32>
      %cst_20 = arith.constant dense<0.000000e+00> : vector<16xf32>
      %26 = vector.multi_reduction <add>, %25, %cst_20 [1] : vector<16x128xf32> to vector<16xf32>
      %27 = vector.shape_cast %26 : vector<16xf32> to vector<16x1xf32>
      %cst_21 = arith.constant 1.280000e+02 : f32
      %28 = vector.broadcast %cst_21 : f32 to vector<16x1xf32>
      %29 = arith.divf %27, %28 : vector<16x1xf32>
      %30 = vector.broadcast %29 : vector<16x1xf32> to vector<16x128xf32>
      %31 = arith.subf %25, %30 : vector<16x128xf32>
      %32 = arith.mulf %31, %31 : vector<16x128xf32>
      %cst_22 = arith.constant dense<0.000000e+00> : vector<16xf32>
      %33 = vector.multi_reduction <add>, %32, %cst_22 [1] : vector<16x128xf32> to vector<16xf32>
      %34 = vector.shape_cast %33 : vector<16xf32> to vector<16x1xf32>
      %cst_23 = arith.constant 1.280000e+02 : f32
      %35 = vector.broadcast %cst_23 : f32 to vector<16x1xf32>
      %36 = arith.divf %34, %35 : vector<16x1xf32>
      %cst_24 = arith.constant 9.99999974E-6 : f32
      %37 = vector.broadcast %cst_24 : f32 to vector<16x1xf32>
      %38 = arith.addf %36, %37 : vector<16x1xf32>
      %39 = math.rsqrt %38 : vector<16x1xf32>
      %40 = vector.broadcast %39 : vector<16x1xf32> to vector<16x128xf32>
      %41 = arith.mulf %31, %40 : vector<16x128xf32>
      %42 = vector.extract_strided_slice %21 {offsets = [1, 0], sizes = [1, 128], strides = [1, 1]} : vector<3x128xf32> to vector<1x128xf32>
      %43 = vector.broadcast %42 : vector<1x128xf32> to vector<16x128xf32>
      %44 = arith.mulf %41, %43 : vector<16x128xf32>
      %45 = vector.extract_strided_slice %21 {offsets = [2, 0], sizes = [1, 128], strides = [1, 1]} : vector<3x128xf32> to vector<1x128xf32>
      %46 = vector.broadcast %45 : vector<1x128xf32> to vector<16x128xf32>
      %47 = arith.addf %44, %46 : vector<16x128xf32>
      %c0_25 = arith.constant 0 : index
      %c0_26 = arith.constant 0 : index
      %48 = vector.load %arg7[%c0_25, %c0_26] : memref<16x128xf32, #tpu.memory_space<vmem>>, vector<16x128xf32>
      tpu.vector_store %arg7[%c0_25, %c0_26], %47 {strides = array<i32>} : memref<16x128xf32, #tpu.memory_space<vmem>>, vector<16x128xf32>,
    } else {
    }
    return
  }
  func.func @transform_0(%arg0: i32, %arg1: i32) -> (i32, i32) {
    %c0_i32 = arith.constant 0 : i32
    %c0_i32_0 = arith.constant 0 : i32
    return %arg0, %c0_i32 : i32, i32
  }
  func.func @transform_1(%arg0: i32, %arg1: i32) -> (i32, i32) {
    %c0_i32 = arith.constant 0 : i32
    %c0_i32_0 = arith.constant 0 : i32
    return %c0_i32, %arg1 : i32, i32
  }
  func.func @transform_2(%arg0: i32, %arg1: i32) -> (i32, i32) {
    %c0_i32 = arith.constant 0 : i32
    %c0_i32_0 = arith.constant 0 : i32
    return %c0_i32, %arg1 : i32, i32
  }
  func.func @transform_3(%arg0: i32, %arg1: i32) -> (i32, i32) {
    %c0_i32 = arith.constant 0 : i32
    %c0_i32_0 = arith.constant 0 : i32
    return %arg1, %c0_i32 : i32, i32
  }
  func.func @transform_4(%arg0: i32, %arg1: i32) -> (i32, i32) {
    %c0_i32 = arith.constant 0 : i32
    %c0_i32_0 = arith.constant 0 : i32
    %c0_i32_1 = arith.constant 0 : i32
    return %c0_i32, %c0_i32_0 : i32, i32
  }
  func.func @transform_5(%arg0: i32, %arg1: i32) -> (i32, i32) {
    %c0_i32 = arith.constant 0 : i32
    %c0_i32_0 = arith.constant 0 : i32
    return %arg0, %c0_i32 : i32, i32
  }
}

</mosaic_0001>

<bundles_post_ra>
// kernel: tpu_custom_call.1
= control target key start
LH: loop header
LB: loop body
LE: loop exit
PB: predicated region body
PF: predicated region fallthrough
CT: control target
= control target key end

     0   :  { %10 = vsyncpa [#allocation4], 0  ;;  %s889_s0 = inlined_call_operand.hbm [shape: f32[16,128], index: 0, kind: input, shape index: {}]   ;;  %s890_s1 = inlined_call_operand.hbm [shape: bf16[128,256], index: 1, kind: input, shape index: {}]   ;;  %s891_s2 = inlined_call_operand.hbm [shape: f32[1,256], index: 2, kind: input, shape index: {}]   ;;  %s892_s3 = inlined_call_operand.hbm [shape: bf16[256,128], index: 3, kind: input, shape index: {}]   ;;  %s893_s4 = inlined_call_operand.hbm [shape: f32[3,128], index: 4, kind: input, shape index: {}]   ;;  %s894_s5 = inlined_call_operand.hbm [shape: f32[16,128], index: 5, kind: output, shape index: {}]  }
   0x1   :  { %11 = vsyncpa [#allocation7], 0 }
   0x2   :  { %12 = vsyncpa [#allocation10], 0 }
   0x3   :  { %13 = vsyncpa [#allocation5], 0  ;;  %s31_s20 = sshll.u32 %s890_s1, 4  ;;  %s816_s21 = smov [#allocation6]   ;;  %s32_s20 = int_to_ptr.hbm [resolvable:$true] %s31_s20 }
   0x4   :  { %s33_s22 = sshll.u32 %s816_s21, 4  ;;  %s55_s25 = sshll.u32 %s892_s3, 4  ;;  %s34_s22 = int_to_ptr.vmem [resolvable:$true] %s33_s22  ;;  %s56_s25 = int_to_ptr.hbm [resolvable:$true] %s55_s25 }
   0x5   :  { %s817_s26 = smov 128   ;;  %s818_s27 = smov 8  }
   0x6   :  { %39 = dma.hbm_to_vmem [thread:$0]  %s32_s20, 2048, %s34_s22, [#allocation7], %s817_s26, %s817_s26, %s818_s27  }
   0x7   :  { %s819_s28 = smov [#allocation9]   ;;  %s820_s30 = smov 64  }
   0x8   :  { %s57_s29 = sshll.u32 %s819_s28, 4  ;;  %s821_s1 = smov 4   ;;  %s58_s29 = int_to_ptr.vmem [resolvable:$true] %s57_s29 }
   0x9   :  { %63 = dma.hbm_to_vmem [thread:$0]  %s56_s25, 2048, %s58_s29, [#allocation10], %s820_s30, %s820_s30, %s821_s1  }
   0xa   :  { %s18_s8 = sshll.u32 %s889_s0, 4  ;;  %s822_s9 = smov [#allocation3]   ;;  %s19_s8 = int_to_ptr.hbm [resolvable:$true] %s18_s8 }
   0xb   :  { %s20_s3 = sshll.u32 %s822_s9, 4  ;;  %s45_s12 = sshll.u32 %s891_s2, 4  ;;  %s21_s3 = int_to_ptr.vmem [resolvable:$true] %s20_s3  ;;  %s46_s12 = int_to_ptr.hbm [resolvable:$true] %s45_s12 }
   0xc   :  { %26 = dma.hbm_to_vmem [thread:$0]  %s19_s8, 256, %s21_s3, [#allocation4], %s817_s26, %s817_s26, %s818_s27  }
   0xd   :  { %s823_s13 = smov [#allocation8]   ;;  %s69_s17 = sshll.u32 %s893_s4, 4  ;;  %s70_s17 = int_to_ptr.hbm [resolvable:$true] %s69_s17 }
   0xe   :  { %s47_s14 = sshll.u32 %s823_s13, 4  ;;  %s824_s0 = smov [#allocation11]   ;;  %s48_s14 = int_to_ptr.vmem [resolvable:$true] %s47_s14 }
   0xf   :  { %50 = dma.hbm_to_vmem [thread:$0]  %s46_s12, 32, %s48_s14, [#allocation7]  }
  0x10   :  { %s71_s18 = sshll.u32 %s824_s0, 4  ;;  %s72_s18 = int_to_ptr.vmem [resolvable:$true] %s71_s18 }
  0x11   :  { %74 = dma.hbm_to_vmem [thread:$0]  %s70_s17, 64, %s72_s18, [#allocation10]  }
  0x12   :  { %808 = dma.done.wait [#allocation4], 256  }
  0x13   :  { %809 = vsyncadd [#allocation4], 4294967040 }
  0x14   :  { %810 = dma.done.wait [#allocation7], 2080  }
  0x15   :  { %811 = vsyncadd [#allocation7], 4294965216 }
  0x16   :  { %812 = dma.done.wait [#allocation10], 2112  }
  0x17   :  { %813 = vsyncadd [#allocation10], 4294965184  ;;  %v545_v0 = vld [vmem:[#allocation6 + $0x70] sm:$0xf]  ;;  %v630_v1 = vld [vmem:[#allocation6 + $0x74] sm:$0xf0] }
  0x18   :  { %v629_v2 = vld [vmem:[#allocation6 + $0x74] sm:$0xf]  ;;  %v546_v3 = vor.u32 %v630_v1, %v545_v0  ;;  %v547_v4 = vld [vmem:[#allocation6 + $0x78] sm:$0xf0]  ;;  %v537_v5 = vld [vmem:[#allocation6 + $0x60] sm:$0xf] }
  0x19   :  { %v628_v6 = vld [vmem:[#allocation6 + $0x64] sm:$0xf0]  ;;  %v550_v7 = vor.u32 %v629_v2, %v547_v4  ;;  %v627_v8 = vld [vmem:[#allocation6 + $0x64] sm:$0xf]  ;;  %v539_v9 = vld [vmem:[#allocation6 + $0x68] sm:$0xf0] }
  0x1a   :  { %206 = vmatpush.bf16.msra.mxu0 %v546_v3  ;;  %v538_v10 = vor.u32 %v628_v6, %v537_v5  ;;  %v542_v11 = vor.u32 %v627_v8, %v539_v9  ;;  %v529_v12 = vld [vmem:[#allocation6 + $0x50] sm:$0xf]  ;;  %v626_v13 = vld [vmem:[#allocation6 + $0x54] sm:$0xf0]  ;;  %v625_v14 = vld [vmem:[#allocation6 + $0x54] sm:$0xf] }
  0x1b   :  { %220 = vmatpush.bf16.msra.mxu1 %v550_v7  ;;  %v531_v15 = vld [vmem:[#allocation6 + $0x58] sm:$0xf0]  ;;  %v530_v16 = vor.u32 %v626_v13, %v529_v12  ;;  %v521_v18 = vld [vmem:[#allocation6 + $0x40] sm:$0xf]  ;;  %v624_v19 = vld [vmem:[#allocation6 + $0x44] sm:$0xf0] }
  0x1c   :  { %v534_v17 = vor.u32 %v625_v14, %v531_v15  ;;  %v623_v20 = vld [vmem:[#allocation6 + $0x44] sm:$0xf]  ;;  %v523_v21 = vld [vmem:[#allocation6 + $0x48] sm:$0xf0]  ;;  %v522_v22 = vor.u32 %v624_v19, %v521_v18  ;;  %v638_v23 = vld [vmem:[#allocation9 + $0x38] sm:$0xff]  ;;  %s826_s2 = smov [#allocation12]  }
  0x1d   :  { %v646_v24 = vld [vmem:[#allocation9 + $0x78] sm:$0xff]  ;;  %v526_v25 = vor.u32 %v623_v20, %v523_v21  ;;  %v513_v26 = vld [vmem:[#allocation6 + $0x30] sm:$0xf]  ;;  %v621_v28 = vld [vmem:[#allocation6 + $0x34] sm:$0xf]  ;;  %370 = vmatpush.bf16.msra.mxu2 %v638_v23  ;;  %s470_s4 = sshll.u32 %s826_s2, 4  ;;  %s471_s4 = int_to_ptr.vmem [resolvable:$true] %s470_s4 }
  0x1e   :  { %207 = vmatpush.bf16.msra.mxu0 %v538_v10  ;;  %v622_v27 = vld [vmem:[#allocation6 + $0x34] sm:$0xf0]  ;;  %v515_v29 = vld [vmem:[#allocation6 + $0x38] sm:$0xf0]  ;;  %384 = vmatpush.bf16.msra.mxu3 %v646_v24  ;;  %v505_v34 = vld [vmem:[#allocation6 + $0x20] sm:$0xf] }
  0x1f   :  { %221 = vmatpush.bf16.msra.mxu1 %v542_v11  ;;  %v637_v30 = vld [vmem:[#allocation9 + $0x30] sm:$0xff]  ;;  %v514_v32 = vor.u32 %v622_v27, %v513_v26  ;;  %v518_v33 = vor.u32 %v621_v28, %v515_v29  ;;  %v620_v35 = vld [vmem:[#allocation6 + $0x24] sm:$0xf0]  ;;  %v619_v36 = vld [vmem:[#allocation6 + $0x24] sm:$0xf]  ;;  %s472_s21 = sshll.u32 %s894_s5, 4  ;;  %s473_s21 = int_to_ptr.hbm [resolvable:$true] %s472_s21 }
  0x20   :  { %v645_v31 = vld [vmem:[#allocation9 + $0x70] sm:$0xff]  ;;  %v507_v37 = vld [vmem:[#allocation6 + $0x28] sm:$0xf0]  ;;  %v506_v40 = vor.u32 %v620_v35, %v505_v34  ;;  %v499_v45 = vld [vmem:[#allocation6 + $0x18] sm:$0xf0] }
  0x21   :  { %371 = vmatpush.bf16.msra.mxu2 %v637_v30  ;;  %v636_v38 = vld [vmem:[#allocation9 + $0x28] sm:$0xff]  ;;  %v510_v41 = vor.u32 %v619_v36, %v507_v37  ;;  %v618_v43 = vld [vmem:[#allocation6 + $0x14] sm:$0xf0]  ;;  %v617_v44 = vld [vmem:[#allocation6 + $0x14] sm:$0xf]  ;;  %v825_v30 = vmov 128.0  }
  0x22   :  { %208 = vmatpush.bf16.msra.mxu0 %v530_v16  ;;  %385 = vmatpush.bf16.msra.mxu3 %v645_v31  ;;  %v644_v39 = vld [vmem:[#allocation9 + $0x68] sm:$0xff]  ;;  %v635_v46 = vld [vmem:[#allocation9 + $0x20] sm:$0xff]  ;;  %v502_v49 = vor.u32 %v617_v44, %v499_v45  ;;  %v102_v56 = vld [vmem:[#allocation3 + $0x8] sm:$0xff]  ;;  %658 = vrcp.f32 %v825_v30 }
  0x23   :  { %222 = vmatpush.bf16.msra.mxu1 %v534_v17  ;;  %v497_v42 = vld [vmem:[#allocation6 + $0x10] sm:$0xf]  ;;  %v643_v47 = vld [vmem:[#allocation9 + $0x60] sm:$0xff]  ;;  %v491_v53 = vld [vmem:[#allocation6 + $0x8] sm:$0xf0] }
  0x24   :  { %v498_v48 = vor.u32 %v618_v43, %v497_v42  ;;  %v489_v50 = vld [vmem:[#allocation6] sm:$0xf]  ;;  %v616_v51 = vld [vmem:[#allocation6 + $0x4] sm:$0xf0]  ;;  %v615_v52 = vld [vmem:[#allocation6 + $0x4] sm:$0xf] }
  0x25   :  { %372 = vmatpush.bf16.msra.mxu2 %v636_v38  ;;  %v490_v54 = vor.u32 %v616_v51, %v489_v50  ;;  %v101_v55 = vld [vmem:[#allocation3] sm:$0xff]  ;;  %v494_v57 = vor.u32 %v615_v52, %v491_v53  ;;  %v634_v59 = vld [vmem:[#allocation9 + $0x18] sm:$0xff]  ;;  %v631_v1 = vld [vmem:[#allocation9] sm:$0xff] }
  0x26   :  { %209 = vmatpush.bf16.msra.mxu0 %v522_v22  ;;  %386 = vmatpush.bf16.msra.mxu3 %v644_v39  ;;  %v103_v58 = vpack.c.bf16 %v102_v56, %v101_v55  ;;  %v642_v60 = vld [vmem:[#allocation9 + $0x58] sm:$0xff]  ;;  %v633_v61 = vld [vmem:[#allocation9 + $0x10] sm:$0xff]  ;;  %v632_v63 = vld [vmem:[#allocation9 + $0x8] sm:$0xff] }
  0x27   :  { %223 = vmatpush.bf16.msra.mxu1 %v526_v25  ;;  %v641_v62 = vld [vmem:[#allocation9 + $0x50] sm:$0xff]  ;;  %v640_v0 = vld [vmem:[#allocation9 + $0x48] sm:$0xff]  ;;  %v639_v2 = vld [vmem:[#allocation9 + $0x40] sm:$0xff] }
  0x28   :  { %v120_v3 = vld [vmem:[#allocation8] sm:$0x3]  ;;  %v878_v20 = vld [vmem:[#allocation11] sm:$0x7]  ;;  %v659_v31 = vpop.eup %658 }
  0x29   :  { %373 = vmatpush.bf16.msra.mxu2 %v635_v46  ;;  %v122_v6 = vperm.slane %v120_v3, 0  ;;  %v123_v7 = vperm.slane %v120_v3, 1  ;;  %v408_v22 = vperm.slane %v878_v20, 0  ;;  %vm420_vm0 = vweird.f32 %v659_v31 }
  0x2a   :  { %210 = vmatpush.bf16.msra.mxu0 %v514_v32  ;;  %387 = vmatpush.bf16.msra.mxu3 %v643_v47  ;;  %v416_v32 = vmul.f32 128.0, %v659_v31 }
  0x2b   :  { %224 = vmatpush.bf16.msra.mxu1 %v518_v33 }
  0x2c   :  { %v417_v33 = vsub.f32 1.0, %v416_v32 }
  0x2d   :  { %374 = vmatpush.bf16.msra.mxu2 %v634_v59  ;;  %v458_v59 = vperm.slane %v878_v20, 1 }
  0x2e   :  { %211 = vmatpush.bf16.msra.mxu0 %v506_v40  ;;  %388 = vmatpush.bf16.msra.mxu3 %v642_v60  ;;  %v418_v34 = vmul.f32 %v659_v31, %v417_v33 }
  0x2f   :  { %225 = vmatpush.bf16.msra.mxu1 %v510_v41 }
  0x30   :  { %v419_v35 = vadd.f32 %v659_v31, %v418_v34 }
  0x31   :  { %375 = vmatpush.bf16.msra.mxu2 %v633_v61 }
  0x32   :  { %212 = vmatpush.bf16.msra.mxu0 %v498_v48  ;;  %389 = vmatpush.bf16.msra.mxu3 %v641_v62  ;;  %v421_v36 = vsel %vm420_vm0, %v659_v31, %v419_v35  ;;  %v461_v62 = vperm.slane %v878_v20, 2 }
  0x33   :  { %226 = vmatpush.bf16.msra.mxu1 %v502_v49 }
  0x35   :  { %376 = vmatpush.bf16.msra.mxu2 %v632_v63 }
  0x36   :  { %213 = vmatpush.bf16.msra.mxu0 %v490_v54  ;;  %390 = vmatpush.bf16.msra.mxu3 %v640_v0 }
  0x37   :  { %227 = vmatpush.bf16.msra.mxu1 %v494_v57 }
  0x39   :  { %214 = vmatmul.bf16.vlgmr.msra.gmra.mxu0 %v103_v58  ;;  %377 = vmatpush.bf16.msra.mxu2 %v631_v1 }
  0x3a   :  { %228 = vmatmul.bf16.vlgmr.msra.gmra.mxu1 %v103_v58  ;;  %391 = vmatpush.bf16.msra.mxu3 %v639_v2 }
  0xb6   :  { %v215_v4 = vpop.f32.mrf.mxu0 }
  0xb7   :  { %v229_v5 = vpop.f32.mrf.mxu1  ;;  %v216_v8 = vadd.f32 %v215_v4, %v122_v6 }
  0xb8   :  { %v230_v9 = vadd.f32 %v229_v5, %v123_v7 }
  0xb9   :  { %v234_v14 = vmax.f32 %v216_v8, 0.0 }
  0xba   :  { %v235_v16 = vmax.f32 %v230_v9, 0.0 }
  0xbe   :  { %v217_v10 = vpop.f32.mrf.mxu0 }
  0xbf   :  { %v218_v11 = vadd.f32 %v217_v10, %v122_v6  ;;  %v231_v12 = vpop.f32.mrf.mxu1 }
  0xc0   :  { %v232_v13 = vadd.f32 %v231_v12, %v123_v7 }
  0xc1   :  { %v236_v15 = vmax.f32 %v218_v11, 0.0 }
  0xc2   :  { %v237_v17 = vmax.f32 %v232_v13, 0.0 }
  0xc3   :  { %v238_v18 = vpack.c.bf16 %v236_v15, %v234_v14 }
  0xc4   :  { %v239_v19 = vpack.c.bf16 %v237_v17, %v235_v16 }
  0xc5   :  { %378 = vmatmul.bf16.vlgmr.msra.gmra.mxu2 %v238_v18 }
  0xc6   :  { %392 = vmatmul.bf16.vlgmr.msra.gmra.mxu3 %v239_v19 }
 0x148   :  { %v379_v21 = vpop.f32.mrf.mxu2 }
 0x149   :  { %v393_v23 = vpop.f32.mrf.mxu3 }
 0x14a   :  { %v394_v24 = vadd.f32 %v393_v23, %v379_v21 }
 0x14c   :  { %v409_v25 = vadd.f32 %v408_v22, %v394_v24 }
 0x14e   :  { %411 = vadd.xlane.f32.xlu0 %v409_v25 }
 0x150   :  { %v381_v26 = vpop.f32.mrf.mxu2 }
 0x151   :  { %v395_v27 = vpop.f32.mrf.mxu3 }
 0x152   :  { %v396_v28 = vadd.f32 %v395_v27, %v381_v26 }
 0x154   :  { %v410_v29 = vadd.f32 %v408_v22, %v396_v28 }
 0x156   :  { %413 = vadd.xlane.f32.xlu0 %v410_v29 }
 0x1c1   :  { %v412_v37 = vpop.xlane.xlu0 %411 }
 0x1c2   :  { %v422_v38 = vmul.f32 %v421_v36, %v412_v37 }
 0x1c4   :  { %v424_v39 = vsub.f32 %v409_v25, %v422_v38 }
 0x1c6   :  { %v426_v40 = vmul.f32 %v424_v39, %v424_v39 }
 0x1c8   :  { %428 = vadd.xlane.f32.xlu1 %v426_v40 }
 0x1c9   :  { %v414_v41 = vpop.xlane.xlu0 %413 }
 0x1ca   :  { %v423_v42 = vmul.f32 %v421_v36, %v414_v41 }
 0x1cc   :  { %v425_v43 = vsub.f32 %v410_v29, %v423_v42 }
 0x1ce   :  { %v427_v44 = vmul.f32 %v425_v43, %v425_v43 }
 0x1d0   :  { %430 = vadd.xlane.f32.xlu1 %v427_v44 }
 0x23b   :  { %v429_v45 = vpop.xlane.xlu1 %428 }
 0x23c   :  { %v432_v46 = vmul.f32 %v429_v45, %v421_v36 }
 0x23e   :  { %v434_v47 = vadd.f32 1e-05, %v432_v46 }
 0x240   :  { %660 = vrsqrt.f32 %v434_v47  ;;  %vm442_vm2 = vweird.f32 %v434_v47 }
 0x243   :  { %v431_v48 = vpop.xlane.xlu1 %430 }
 0x244   :  { %v433_v49 = vmul.f32 %v431_v48, %v421_v36 }
 0x246   :  { %v661_v50 = vpop.eup %660  ;;  %v435_v51 = vadd.f32 1e-05, %v433_v49 }
 0x247   :  { %v437_v52 = vmul.f32 %v661_v50, %v434_v47  ;;  %vm443_vm1 = vweird.f32 %v661_v50 }
 0x248   :  { %662 = vrsqrt.f32 %v435_v51  ;;  %vm444_vm3 = vmor %vm442_vm2, %vm443_vm1  ;;  %vm452_vm5 = vweird.f32 %v435_v51 }
 0x249   :  { %v438_v53 = vmul.f32 %v661_v50, %v437_v52 }
 0x24b   :  { %v439_v54 = vmul.f32 0.5, %v438_v53 }
 0x24d   :  { %v440_v55 = vsub.f32 1.5, %v439_v54 }
 0x24e   :  { %v663_v56 = vpop.eup %662 }
 0x24f   :  { %v441_v57 = vmul.f32 %v661_v50, %v440_v55  ;;  %v447_v58 = vmul.f32 %v663_v56, %v435_v51  ;;  %vm453_vm4 = vweird.f32 %v663_v56 }
 0x250   :  { %vm454_vm6 = vmor %vm452_vm5, %vm453_vm4 }
 0x251   :  { %v445_v60 = vsel %vm444_vm3, %v661_v50, %v441_v57  ;;  %v448_v61 = vmul.f32 %v663_v56, %v447_v58 }
 0x252   :  { %v456_v63 = vmul.f32 %v445_v60, %v424_v39 }
 0x253   :  { %v449_v0 = vmul.f32 0.5, %v448_v61 }
 0x254   :  { %v459_v1 = vmul.f32 %v458_v59, %v456_v63 }
 0x255   :  { %v450_v2 = vsub.f32 1.5, %v449_v0 }
 0x256   :  { %v462_v3 = vadd.f32 %v461_v62, %v459_v1 }
 0x257   :  { %v451_v4 = vmul.f32 %v663_v56, %v450_v2 }
 0x258   :  { %464 = vst [vmem:[#allocation12] sm:$0xff] %v462_v3 }
 0x259   :  { %v455_v5 = vsel %vm454_vm6, %v663_v56, %v451_v4 }
 0x25a   :  { %v457_v6 = vmul.f32 %v455_v5, %v425_v43 }
 0x25c   :  { %v460_v7 = vmul.f32 %v458_v59, %v457_v6 }
 0x25e   :  { %v463_v8 = vadd.f32 %v461_v62, %v460_v7 }
 0x260   :  { %465 = vst [vmem:[#allocation12 + $0x8] sm:$0xff] %v463_v8 }
 0x261   :  { %478 = dma.vmem_to_hbm [thread:$0]  %s471_s4, 256, %s473_s21, [#allocation5], %s817_s26, %s817_s26, %s818_s27  }
 0x262   :  { %814 = dma.done.wait [#allocation5], 256  }
 0x263   :  { %815 = vsyncadd [#allocation5], 4294967040 }
 0x264   :  { %483 = vsyncpa [#allocation4], 1 }
 0x265   :  { %484 = vsyncpa [#allocation7], 1 }
 0x266   :  { %485 = vsyncpa [#allocation10], 1 }
 0x267   :  { %486 = vsyncpa [#allocation5], 1 }

</bundles_post_ra>
